<compile_context>
chip_gen: v7x
topology: tpu7x:2x2x1
jax: 0.10.0
libtpu: 0.0.40
codegen_flags: <defaults>
</compile_context>

<pallas_src>
import functools

import jax
import jax.numpy as jnp
from jax.experimental import pallas as pl
from jax.experimental.pallas import tpu as pltpu

_EPS = 1e-6          # PyTorch pairwise_distance default eps (added to the difference)
_LANE = 128
_SUBLANE = 8
# 3 inputs x 2 pipeline buffers of one (VMEM-padded) tile must fit this budget.
_TILE_BUDGET_BYTES = 24 * 1024 * 1024
_VMEM_LIMIT_BYTES = 48 * 1024 * 1024


def _round_down(x, m):
    return max(m, (x // m) * m)


def _round_up(x, m):
    return ((x + m - 1) // m) * m


def _hinge_kernel(a_ref, p_ref, n_ref, o_ref, *, margin, batch, block_b):
    """Blocks are (block_b, D); D sits on the lane axis, batch on sublanes."""
    a = a_ref[...].astype(jnp.float32)
    p = p_ref[...].astype(jnp.float32)
    n = n_ref[...].astype(jnp.float32)

    # F.pairwise_distance(x, y, p=2, eps=1e-6) == ||x - y + eps||_2 over D.
    dp = a - p + _EPS
    dn = a - n + _EPS
    pos = jnp.sqrt(jnp.sum(dp * dp, axis=1, keepdims=True))   # (block_b, 1)
    neg = jnp.sqrt(jnp.sum(dn * dn, axis=1, keepdims=True))   # (block_b, 1)
    loss = jnp.maximum(pos - neg + margin, 0.0)

    # Zero out padded batch rows (tiles past the true batch size). `where` is a
    # select, so garbage (even NaN) in the padded region cannot leak through.
    row = pl.program_id(0) * block_b + jax.lax.broadcasted_iota(
        jnp.int32, (block_b, 1), 0)
    o_ref[...] = jnp.where(row < batch, loss, 0.0)


def triplet_loss(anchor, positive, negative, margin=1.0, *, block_batch=None):
    """Mean triplet margin loss, matching the PyTorch TripletLoss module."""
    assert anchor.ndim == 2
    assert anchor.shape == positive.shape == negative.shape
    assert anchor.dtype == positive.dtype == negative.dtype
    B, D = anchor.shape
    itemsize = anchor.dtype.itemsize

    # VMEM footprint per row uses the lane-padded width (last dim pads to 128).
    d_pad = _round_up(D, _LANE)
    rows_budget = max(_SUBLANE, _TILE_BUDGET_BYTES // (6 * d_pad * itemsize))

    if block_batch is not None:
        tb = min(int(block_batch), B)
    else:
        tb = rows_budget
    if tb >= B:
        tb = B                              # one block == full batch (always legal)
    else:
        tb = _round_down(tb, _SUBLANE)      # partial blocks must be 8-aligned

    num_tiles = (B + tb - 1) // tb
    padded_b = num_tiles * tb

    cost = pl.CostEstimate(
        flops=int(8 * B * D + 4 * B),
        transcendentals=int(2 * B),
        bytes_accessed=int(3 * B * D * itemsize + padded_b * 4),
    )
    cparams = pltpu.CompilerParams(
        dimension_semantics=("parallel",),
        vmem_limit_bytes=_VMEM_LIMIT_BYTES,
    )

    kernel = functools.partial(
        _hinge_kernel, margin=float(margin), batch=B, block_b=tb)
    in_spec = pl.BlockSpec((tb, D), lambda i: (i, 0))
    out_spec = pl.BlockSpec((tb, 1), lambda i: (i, 0))
    losses = pl.pallas_call(
        kernel,
        grid=(num_tiles,),
        in_specs=[in_spec, in_spec, in_spec],
        out_specs=out_spec,
        out_shape=jax.ShapeDtypeStruct((padded_b, 1), jnp.float32),
        compiler_params=cparams,
        cost_estimate=cost,
    )(anchor, positive, negative)

    # Final reduction over padded_b scalars (padded rows are exactly 0);
    # negligible next to the kernel's HBM traffic, keeps the grid parallel.
    return jnp.sum(losses) / B


def triplet_loss_ref(anchor, positive, negative, margin=1.0):
    a = anchor.astype(jnp.float32)
    p = positive.astype(jnp.float32)
    n = negative.astype(jnp.float32)
    pos = jnp.sqrt(jnp.sum((a - p + _EPS) ** 2, axis=-1))
    neg = jnp.sqrt(jnp.sum((a - n + _EPS) ** 2, axis=-1))
    return jnp.mean(jnp.maximum(pos - neg + margin, 0.0))


if __name__ == "__main__":
    key = jax.random.PRNGKey(0)

    # (B, D, dtype, forced batch tile) — exercises: single full-batch block,
    # multi-tile path with padded/masked rows, non-multiple-of-8 batch,
    # D % 128 == 0 layout, and native-bf16 inputs.
    cases = [
        (8, 32, jnp.float32, None),
        (200, 32, jnp.float32, 128),
        (13, 40, jnp.float32, None),
        (50, 32, jnp.float32, 16),
        (24, 128, jnp.float32, None),
        (64, 256, jnp.bfloat16, None),
    ]
    for (b, d, dtype, blk) in cases:
        key, k_a, k_p, k_n = jax.random.split(key, 4)
        anchor = jax.random.normal(k_a, (b, d), dtype=jnp.float32).astype(dtype)
        positive = jax.random.normal(k_p, (b, d), dtype=jnp.float32).astype(dtype)
        negative = jax.random.normal(k_n, (b, d), dtype=jnp.float32).astype(dtype)

        loss = triplet_loss(anchor, positive, negative, margin=1.0,
                            block_batch=blk)
        loss = jax.block_until_ready(loss)
        ref = triplet_loss_ref(anchor, positive, negative, margin=1.0)
        assert jnp.allclose(loss, ref, atol=1e-3, rtol=1e-3), (
            b, d, dtype, loss, ref)

    print("KERNEL_OK")
</pallas_src>

<mosaic_0001>
module attributes {stable_mosaic.version = 11 : i64} {
  func.func @_hinge_kernel(%arg0: i32, %arg1: memref<8x32xf32, #tpu.memory_space<vmem>>, %arg2: memref<8x32xf32, #tpu.memory_space<vmem>>, %arg3: memref<8x32xf32, #tpu.memory_space<vmem>>, %arg4: memref<8x1xf32, #tpu.memory_space<vmem>>) attributes {dimension_semantics = [#tpu.dimension_semantics<parallel>], iteration_bounds = array<i64: 1>, scalar_prefetch = 0 : i64, scratch_operands = 0 : i64, tpu.core_type = #tpu.core_type<tc>, window_params = [{transform_indices = @transform_0, window_bounds = array<i64: 8, 32>}, {transform_indices = @transform_1, window_bounds = array<i64: 8, 32>}, {transform_indices = @transform_2, window_bounds = array<i64: 8, 32>}, {transform_indices = @transform_3, window_bounds = array<i64: 8, 1>}]} {
    %c0 = arith.constant 0 : index
    %c0_0 = arith.constant 0 : index
    %0 = vector.load %arg1[%c0, %c0_0] : memref<8x32xf32, #tpu.memory_space<vmem>>, vector<8x32xf32>
    %c0_1 = arith.constant 0 : index
    %c0_2 = arith.constant 0 : index
    %1 = vector.load %arg2[%c0_1, %c0_2] : memref<8x32xf32, #tpu.memory_space<vmem>>, vector<8x32xf32>
    %c0_3 = arith.constant 0 : index
    %c0_4 = arith.constant 0 : index
    %2 = vector.load %arg3[%c0_3, %c0_4] : memref<8x32xf32, #tpu.memory_space<vmem>>, vector<8x32xf32>
    %3 = arith.subf %0, %1 : vector<8x32xf32>
    %cst = arith.constant 9.99999997E-7 : f32
    %4 = vector.broadcast %cst : f32 to vector<8x32xf32>
    %5 = arith.addf %3, %4 : vector<8x32xf32>
    %6 = arith.subf %0, %2 : vector<8x32xf32>
    %cst_5 = arith.constant 9.99999997E-7 : f32
    %7 = vector.broadcast %cst_5 : f32 to vector<8x32xf32>
    %8 = arith.addf %6, %7 : vector<8x32xf32>
    %9 = arith.mulf %5, %5 : vector<8x32xf32>
    %cst_6 = arith.constant dense<0.000000e+00> : vector<8xf32>
    %10 = vector.multi_reduction <add>, %9, %cst_6 [1] : vector<8x32xf32> to vector<8xf32>
    %11 = vector.shape_cast %10 : vector<8xf32> to vector<8x1xf32>
    %12 = math.sqrt %11 : vector<8x1xf32>
    %13 = arith.mulf %8, %8 : vector<8x32xf32>
    %cst_7 = arith.constant dense<0.000000e+00> : vector<8xf32>
    %14 = vector.multi_reduction <add>, %13, %cst_7 [1] : vector<8x32xf32> to vector<8xf32>
    %15 = vector.shape_cast %14 : vector<8xf32> to vector<8x1xf32>
    %16 = math.sqrt %15 : vector<8x1xf32>
    %17 = arith.subf %12, %16 : vector<8x1xf32>
    %cst_8 = arith.constant 1.000000e+00 : f32
    %18 = vector.broadcast %cst_8 : f32 to vector<8x1xf32>
    %19 = arith.addf %17, %18 : vector<8x1xf32>
    %cst_9 = arith.constant 0.000000e+00 : f32
    %20 = vector.broadcast %cst_9 : f32 to vector<8x1xf32>
    %21 = arith.maximumf %19, %20 : vector<8x1xf32>
    %c8_i32 = arith.constant 8 : i32
    %22 = arith.muli %arg0, %c8_i32 : i32
    %23 = tpu.iota {dimensions = array<i32: 0>} : vector<8x1xi32>
    %24 = vector.broadcast %22 : i32 to vector<8x1xi32>
    %25 = arith.addi %24, %23 : vector<8x1xi32>
    %c8_i32_10 = arith.constant 8 : i32
    %26 = vector.broadcast %c8_i32_10 : i32 to vector<8x1xi32>
    %27 = arith.cmpi slt, %25, %26 : vector<8x1xi32>
    %cst_11 = arith.constant 0.000000e+00 : f32
    %28 = vector.broadcast %cst_11 : f32 to vector<8x1xf32>
    %29 = arith.select %27, %21, %28 : vector<8x1xi1>, vector<8x1xf32>
    %c0_12 = arith.constant 0 : index
    %c0_13 = arith.constant 0 : index
    %30 = vector.load %arg4[%c0_12, %c0_13] : memref<8x1xf32, #tpu.memory_space<vmem>>, vector<8x1xf32>
    tpu.vector_store %arg4[%c0_12, %c0_13], %29 {strides = array<i32>} : memref<8x1xf32, #tpu.memory_space<vmem>>, vector<8x1xf32>,
    return
  }
  func.func @transform_0(%arg0: i32) -> (i32, i32) {
    %c0_i32 = arith.constant 0 : i32
    %c0_i32_0 = arith.constant 0 : i32
    return %arg0, %c0_i32 : i32, i32
  }
  func.func @transform_1(%arg0: i32) -> (i32, i32) {
    %c0_i32 = arith.constant 0 : i32
    %c0_i32_0 = arith.constant 0 : i32
    return %arg0, %c0_i32 : i32, i32
  }
  func.func @transform_2(%arg0: i32) -> (i32, i32) {
    %c0_i32 = arith.constant 0 : i32
    %c0_i32_0 = arith.constant 0 : i32
    return %arg0, %c0_i32 : i32, i32
  }
  func.func @transform_3(%arg0: i32) -> (i32, i32) {
    %c0_i32 = arith.constant 0 : i32
    %c0_i32_0 = arith.constant 0 : i32
    return %arg0, %c0_i32 : i32, i32
  }
}

</mosaic_0001>

<bundles_post_ra>
// kernel: tpu_custom_call.1
= control target key start
LH: loop header
LB: loop body
LE: loop exit
PB: predicated region body
PF: predicated region fallthrough
CT: control target
= control target key end

     0   :  { %8 = vsyncpa [#allocation3], 0  ;;  %s236_s0 = inlined_call_operand.hbm [shape: f32[8,32], index: 0, kind: input, shape index: {}]   ;;  %s237_s1 = inlined_call_operand.hbm [shape: f32[8,32], index: 1, kind: input, shape index: {}]   ;;  %s238_s2 = inlined_call_operand.hbm [shape: f32[8,32], index: 2, kind: input, shape index: {}]   ;;  %s239_s3 = inlined_call_operand.vmem [shape: f32[8,1], index: 3, kind: output, shape index: {}]  }
   0x1   :  { %9 = vsyncpa [#allocation5], 0  ;;  %s174_s12 = smov [#allocation4]   ;;  %s175_s14 = smov [#allocation2]  }
   0x2   :  { %s26_s13 = sshll.u32 %s174_s12, 4  ;;  %s16_s15 = sshll.u32 %s175_s14, 4  ;;  %s27_s13 = int_to_ptr.vmem [resolvable:$true] %s26_s13  ;;  %s17_s15 = int_to_ptr.vmem [resolvable:$true] %s16_s15 }
   0x3   :  { %s104_s18 = scalar_lea.hbm %s237_s1, 128 }
   0x4   :  { %p105_p0 = scmp.ne.s32.totalorder %s237_s1, %s104_s18  ;;  %p108_p1 = scmp.lt.u32.totalorder %s104_s18, %s237_s1 }
   0x6   :  { %p110_p2 = pnand %p108_p1, %p105_p0 }
   0x8   :  { %113 = shalt.err (!%p110_p2)
}
   0x9   :  { %s114_s23 = scalar_lea.vmem %s27_s13, 128  ;;  %p119_p4 = scmp.lt.s32.totalorder %s27_s13, %s27_s13 }
   0xa   :  { %p115_p3 = scmp.ne.s32.totalorder %s27_s13, %s114_s23  ;;  %p120_p5 = scmp.lt.s32.totalorder %s114_s23, %s114_s23 }
   0xc   :  { %p121_p6 = por %p120_p5, %p119_p4 }
   0xe   :  { %p122_p7 = pnand %p121_p6, %p115_p3 }
  0x10   :  { %125 = shalt.err (!%p122_p7)
}
  0x11   :  { %29 = dma.hbm_to_vmem [thread:$0]  %s237_s1, 128, %s27_s13, [#allocation5]  }
  0x12   :  { %s126_s28 = scalar_lea.hbm %s236_s0, 128 }
  0x13   :  { %p127_p8 = scmp.ne.s32.totalorder %s236_s0, %s126_s28  ;;  %p130_p9 = scmp.lt.u32.totalorder %s126_s28, %s236_s0 }
  0x15   :  { %p132_p10 = pnand %p130_p9, %p127_p8 }
  0x17   :  { %135 = shalt.err (!%p132_p10)
}
  0x18   :  { %s136_s6 = scalar_lea.vmem %s17_s15, 128  ;;  %p141_p12 = scmp.lt.s32.totalorder %s17_s15, %s17_s15 }
  0x19   :  { %p137_p11 = scmp.ne.s32.totalorder %s17_s15, %s136_s6  ;;  %p142_p13 = scmp.lt.s32.totalorder %s136_s6, %s136_s6 }
  0x1b   :  { %p143_p0 = por %p142_p13, %p141_p12 }
  0x1d   :  { %p144_p1 = pnand %p143_p0, %p137_p11 }
  0x1f   :  { %147 = shalt.err (!%p144_p1)
}
  0x20   :  { %19 = dma.hbm_to_vmem [thread:$0]  %s236_s0, 128, %s17_s15, [#allocation3]  }
  0x21   :  { %s176_s8 = smov [#allocation6]   ;;  %s148_s12 = scalar_lea.hbm %s238_s2, 128 }
  0x22   :  { %s36_s9 = sshll.u32 %s176_s8, 4  ;;  %p149_p2 = scmp.ne.s32.totalorder %s238_s2, %s148_s12  ;;  %s37_s9 = int_to_ptr.vmem [resolvable:$true] %s36_s9 }
  0x23   :  { %p152_p3 = scmp.lt.u32.totalorder %s148_s12, %s238_s2 }
  0x25   :  { %p154_p4 = pnand %p152_p3, %p149_p2 }
  0x27   :  { %157 = shalt.err (!%p154_p4)
}
  0x28   :  { %s158_s18 = scalar_lea.vmem %s37_s9, 128  ;;  %p163_p6 = scmp.lt.s32.totalorder %s37_s9, %s37_s9 }
  0x29   :  { %p159_p5 = scmp.ne.s32.totalorder %s37_s9, %s158_s18  ;;  %p164_p7 = scmp.lt.s32.totalorder %s158_s18, %s158_s18 }
  0x2b   :  { %p165_p8 = por %p164_p7, %p163_p6 }
  0x2d   :  { %p166_p9 = pnand %p165_p8, %p159_p5 }
  0x2f   :  { %169 = shalt.err (!%p166_p9)
}
  0x30   :  { %39 = dma.hbm_to_vmem [thread:$0]  %s238_s2, 128, %s37_s9, [#allocation5]  }
  0x31   :  { %170 = dma.done.wait [#allocation3], 128  }
  0x32   :  { %171 = vsyncadd [#allocation3], 4294967168 }
  0x33   :  { %172 = dma.done.wait [#allocation5], 256  }
  0x34   :  { %173 = vsyncadd [#allocation5], 4294967040  ;;  %v49_v0 = vld [vmem:[#allocation2] sm:$0xff]  ;;  %v50_v1 = vld [vmem:[#allocation4] sm:$0xff]  ;;  %vm57_vm0 = vcmask 261120   ;;  %vm89_vm5 = vcmask 7168  }
  0x35   :  { %v51_v2 = vld [vmem:[#allocation6] sm:$0xff]  ;;  %v52_v3 = vsub.f32 %v49_v0, %v50_v1 }
  0x36   :  { %v54_v4 = vsub.f32 %v49_v0, %v51_v2 }
  0x37   :  { %v53_v5 = vadd.f32 1e-06, %v52_v3 }
  0x38   :  { %v55_v6 = vadd.f32 1e-06, %v54_v4 }
  0x39   :  { %v56_v7 = vmul.f32 %v53_v5, %v53_v5 }
  0x3a   :  { %v68_v8 = vmul.f32 %v55_v6, %v55_v6 }
  0x3b   :  { %v58_v9 = vsel %vm57_vm0, %v56_v7, 0.0 }
  0x3c   :  { %59 = vadd.xlane.f32.xlu0 %v58_v9  ;;  %v69_v10 = vsel %vm57_vm0, %v68_v8, 0.0 }
  0x40   :  { %70 = vadd.xlane.f32.xlu0 %v69_v10 }
  0xc9   :  { %v60_v11 = vpop.xlane.xlu0 %59 }
  0xca   :  { %100 = vrsqrt.f32 %v60_v11  ;;  %vm63_vm1 = vcmp.eq.f32.partialorder %v60_v11, inf  ;;  %v66_v18 = vand.u32 2147483648, %v60_v11  ;;  %vm65_vm3 = vcmp.eq.f32.partialorder %v60_v11, 0.0 }
  0xcd   :  { %v71_v12 = vpop.xlane.xlu0 %70 }
  0xce   :  { %102 = vrsqrt.f32 %v71_v12  ;;  %vm74_vm2 = vcmp.eq.f32.partialorder %v71_v12, inf  ;;  %v77_v19 = vand.u32 2147483648, %v71_v12  ;;  %vm76_vm4 = vcmp.eq.f32.partialorder %v71_v12, 0.0 }
  0xd4   :  { %v101_v13 = vpop.eup %100 }
  0xd5   :  { %v62_v14 = vmul.f32 %v101_v13, %v60_v11 }
  0xd7   :  { %v64_v16 = vsel %vm63_vm1, %v60_v11, %v62_v14 }
  0xd8   :  { %v103_v15 = vpop.eup %102  ;;  %v67_v21 = vsel %vm65_vm3, %v66_v18, %v64_v16 }
  0xd9   :  { %v73_v17 = vmul.f32 %v103_v15, %v71_v12 }
  0xdb   :  { %v75_v20 = vsel %vm74_vm2, %v71_v12, %v73_v17 }
  0xdc   :  { %v78_v22 = vsel %vm76_vm4, %v77_v19, %v75_v20 }
  0xdd   :  { %v79_v23 = vsub.f32 %v67_v21, %v78_v22 }
  0xdf   :  { %v80_v24 = vadd.f32 1.0, %v79_v23 }
  0xe1   :  { %v81_v25 = vmax.f32 %v80_v24, 0.0 }
  0xe3   :  { %90 = vst.msk [vmem:[%s239_s3] sm:$0xff] %vm89_vm5, %v81_v25 }
  0xe4   :  { %95 = vsyncpa [#allocation3], 1 }
  0xe5   :  { %96 = vsyncpa [#allocation5], 1 }

</bundles_post_ra>
